<compile_context>
chip_gen: v7x
topology: tpu7x:2x2x1
jax: 0.10.0
libtpu: 0.0.40
codegen_flags: <defaults>
</compile_context>

<pallas_src>
import jax
import jax.numpy as jnp
from jax import lax
from jax.experimental import pallas as pl
from jax.experimental.pallas import tpu as pltpu


COMPUTE_DTYPE = jnp.bfloat16   # MXU-native operand / resident-activation dtype


# ---------------------------------------------------------------------------
# Kernel
# ---------------------------------------------------------------------------
def _fused_conv_stack_kernel(x_ref, k_ref, b_ref, o_ref):
    """Runs ALL conv layers for one batch block; the activation never leaves VMEM.

    x_ref : (Nb, H+2, (W+2)*C)        zero-padded, lane-dense input (bf16)
    k_ref : (n*3, (W+2)*C, (W+2)*C)   banded weights, one per (layer, dy) (bf16)
    b_ref : (n, 1, (W+2)*C)           bias over interior columns, 0 on halos (f32)
    o_ref : (Nb, H, W*C)              final output block
    """
    nb, hp, wpc = x_ref.shape
    h, wc = o_ref.shape[1], o_ref.shape[2]
    c = (wpc - wc) // 2                     # channel count == halo width in lanes
    n_layers = b_ref.shape[0]
    rows = nb * h

    padded = x_ref[...]                                     # (Nb, H+2, WpC) bf16
    halo_row = jnp.zeros((nb, 1, wpc), dtype=padded.dtype)

    for l in range(n_layers):                               # fully unrolled
        # One MXU matmul per kernel row dy: the banded weight folds the three
        # horizontal taps + Cin->Cout contraction, so no im2col patch is built.
        taps = [
            jnp.dot(padded[:, dy:dy + h, :].reshape(rows, wpc),   # bf16 operands
                    k_ref[3 * l + dy],
                    preferred_element_type=jnp.float32)           # f32 accumulate
            for dy in range(3)
        ]
        acc = taps[0] + taps[1] + taps[2] + b_ref[l]        # f32 (rows, WpC)
        # Halo columns of `acc` are exact zeros (zero weight columns + masked
        # bias), so re-attaching two zero halo rows restores the padded layout
        # needed by the next layer.
        interior = acc.astype(padded.dtype).reshape(nb, h, wpc)
        padded = jnp.concatenate([halo_row, interior, halo_row], axis=1)

    # Drop halo rows and halo columns for the lane-dense output block.
    o_ref[...] = padded[:, 1:h + 1, c:c + wc].astype(o_ref.dtype)


# ---------------------------------------------------------------------------
# pallas_call wrapper
# ---------------------------------------------------------------------------
def conv_stack(x_lane, k_banded, bias_wide, *, channels, out_dtype):
    """Fused n-layer 3x3 conv stack over a lane-dense padded activation.

    x_lane   : (N, H+2, (W+2)*C)   COMPUTE_DTYPE, zero-padded
    k_banded : (n*3, (W+2)*C, (W+2)*C)
    bias_wide: (n, 1, (W+2)*C)
    returns  : (N, H, W*C) out_dtype
    """
    N, hp, wpc = x_lane.shape
    h = hp - 2
    wc = wpc - 2 * channels
    n3 = k_banded.shape[0]
    n_layers = bias_wide.shape[0]
    assert n3 == 3 * n_layers

    # --- VMEM budget (per grid step): double-buffered in/out blocks, resident
    # weights/bias, plus in-kernel transients (bf16 carry + f32 acc + copies).
    act_bytes = hp * wpc * jnp.dtype(COMPUTE_DTYPE).itemsize
    out_bytes = h * wc * jnp.dtype(out_dtype).itemsize
    w_bytes = (k_banded.size * k_banded.dtype.itemsize
               + bias_wide.size * bias_wide.dtype.itemsize)
    transient_bytes = 6 * hp * wpc * 4
    vmem_est = 2 * act_bytes + 2 * out_bytes + w_bytes + transient_bytes
    vmem_cap = 48 * 1024 * 1024      # safe on v5e/v6e (128 MiB) and v7x (64 MiB)
    assert vmem_est <= vmem_cap, (
        f"fused conv stack needs ~{vmem_est} B VMEM > {vmem_cap} B cap; "
        "use the halo-tiled spatial grid (see TODO at top of file)")
    vmem_limit = int(min(vmem_cap, max(4 * 1024 * 1024, 2 * vmem_est)))

    flops = 2 * N * n_layers * 3 * h * wpc * wpc            # MXU MACs x2
    bytes_accessed = (x_lane.size * x_lane.dtype.itemsize + w_bytes
                      + N * h * wc * jnp.dtype(out_dtype).itemsize)

    return pl.pallas_call(
        _fused_conv_stack_kernel,
        out_shape=jax.ShapeDtypeStruct((N, h, wc), out_dtype),
        grid=(N,),                                           # batch -> both v7x TCs
        in_specs=[
            pl.BlockSpec((1, hp, wpc), lambda b: (b, 0, 0)),        # per-batch activation
            pl.BlockSpec((n3, wpc, wpc), lambda b: (0, 0, 0)),      # all banded weights
            pl.BlockSpec((n_layers, 1, wpc), lambda b: (0, 0, 0)),  # all biases
        ],
        out_specs=pl.BlockSpec((1, h, wc), lambda b: (b, 0, 0)),
        compiler_params=pltpu.CompilerParams(
            dimension_semantics=("parallel",),
            vmem_limit_bytes=vmem_limit),
        cost_estimate=pl.CostEstimate(
            flops=flops, transcendentals=0, bytes_accessed=bytes_accessed),
    )(x_lane, k_banded, bias_wide)


# ---------------------------------------------------------------------------
# Host-side one-time weight packing and the jitted forward
# ---------------------------------------------------------------------------
def pack_conv_stack_params(w_hwio_stacked, b_stacked, W):
    """One-time prep: fold the 3 horizontal taps + Cin->Cout contraction of each
    (layer, dy) into a banded ((W+2)*C, (W+2)*C) matrix acting on the lane-dense
    padded row layout.  Output halo columns are identically zero so the matmul
    itself re-creates the horizontal zero padding of the next layer's input.

    w_hwio_stacked: (n, 3, 3, C, C)   b_stacked: (n, C)
    returns: k_banded (n*3, Wp*C, Wp*C) bf16, bias_wide (n, 1, Wp*C) f32
    """
    n, kh, kw, cin, cout = w_hwio_stacked.shape
    assert kh == 3 and kw == 3 and cin == cout
    C = cin
    Wp = W + 2
    xq = jnp.arange(Wp)                       # padded output column
    xp = jnp.arange(Wp)                       # padded input column
    dx = jnp.arange(3)
    band = xp[None, :, None] == (xq[None, None, :] - 1 + dx[:, None, None])
    interior = (xq >= 1) & (xq <= W)
    sel = (band & interior[None, None, :]).astype(w_hwio_stacked.dtype)   # (3, Wp, Wp)
    # K[l, dy, xp, ci, xq, co] = sum_dx sel[dx, xp, xq] * w[l, dy, dx, ci, co]
    k6 = jnp.einsum("dpq,lydio->lypiqo", sel, w_hwio_stacked)
    k_banded = k6.reshape(n * 3, Wp * C, Wp * C).astype(COMPUTE_DTYPE)
    bias_wide = (interior.astype(jnp.float32)[None, :, None]
                 * b_stacked.astype(jnp.float32)[:, None, :]).reshape(n, 1, Wp * C)
    return k_banded, bias_wide


@jax.jit
def model_forward(x_nchw, k_banded, bias_wide):
    """Equivalent of Model.forward.  x_nchw: (N, C, H, W) -> (N, C, H, W)."""
    N, C, H, W = x_nchw.shape
    x = jnp.transpose(x_nchw, (0, 2, 3, 1))                    # NCHW -> NHWC
    x = jnp.pad(x, ((0, 0), (1, 1), (1, 1), (0, 0)))           # one zero halo for the stack
    x = x.reshape(N, H + 2, (W + 2) * C).astype(COMPUTE_DTYPE)  # lane-dense padded
    y = conv_stack(x, k_banded, bias_wide, channels=C, out_dtype=x_nchw.dtype)
    y = y.reshape(N, H, W, C)
    return jnp.transpose(y, (0, 3, 1, 2))                      # NHWC -> NCHW


# ---------------------------------------------------------------------------
# Params / reference / test
# ---------------------------------------------------------------------------
def init_params(key, ch, n):
    """Deterministic init mimicking PyTorch Conv2d default (uniform +-1/sqrt(fan_in))."""
    fan_in = ch * 3 * 3
    bound = 1.0 / (fan_in ** 0.5)
    ws, bs = [], []
    for _ in range(n):
        key, kw, kb = jax.random.split(key, 3)
        ws.append(jax.random.uniform(kw, (3, 3, ch, ch), jnp.float32, -bound, bound))
        bs.append(jax.random.uniform(kb, (ch,), jnp.float32, -bound, bound))
    return jnp.stack(ws), jnp.stack(bs)        # (n,3,3,Cin,Cout), (n,C)


def _reference_forward(x_nchw, w_hwio_stacked, b_stacked, compute_dtype=None):
    """Pure-JAX reference (XLA conv).  If compute_dtype is set, mirrors the kernel's
    precision (operands/activations cast to it, f32 accumulation + f32 bias)."""
    x = x_nchw.astype(jnp.float32)
    n = w_hwio_stacked.shape[0]
    for i in range(n):
        w_oihw = jnp.transpose(w_hwio_stacked[i], (3, 2, 0, 1)).astype(jnp.float32)
        if compute_dtype is not None:
            x = x.astype(compute_dtype)
            w_oihw = w_oihw.astype(compute_dtype)
        x = lax.conv_general_dilated(
            x, w_oihw, window_strides=(1, 1), padding=((1, 1), (1, 1)),
            dimension_numbers=("NCHW", "OIHW", "NCHW"),
            preferred_element_type=jnp.float32)
        x = x + b_stacked[i].astype(jnp.float32)[None, :, None, None]
    if compute_dtype is not None:
        x = x.astype(compute_dtype)
    return x.astype(jnp.float32)


if __name__ == "__main__":
    ch, n = 4, 3
    N, H, W = 2, 16, 16

    key = jax.random.PRNGKey(0)
    key, kx = jax.random.split(key)
    x = jax.random.normal(kx, (N, ch, H, W), jnp.float32)      # NCHW, like PyTorch

    weights, biases = init_params(key, ch, n)
    k_banded, bias_wide = pack_conv_stack_params(weights, biases, W)   # once, offline

    out = model_forward(x, k_banded, bias_wide)
    out = jax.block_until_ready(out)
    assert out.shape == (N, ch, H, W)

    # Precision-matched reference (bf16 operands/activations, f32 accumulation).
    ref_matched = _reference_forward(x, weights, biases, compute_dtype=COMPUTE_DTYPE)
    err_matched = float(jnp.max(jnp.abs(out - ref_matched)))
    assert err_matched < 2e-2, f"mismatch vs precision-matched reference: {err_matched}"

    # Loose sanity check against the full-f32 reference (bf16-level tolerance).
    ref_f32 = _reference_forward(x, weights, biases)
    err_f32 = float(jnp.max(jnp.abs(out - ref_f32)))
    assert err_f32 < 0.25, f"mismatch vs f32 reference: {err_f32}"

    print("KERNEL_OK")
</pallas_src>

<mosaic_0001>
module attributes {stable_mosaic.version = 11 : i64} {
  func.func @_fused_conv_stack_kernel(%arg0: i32, %arg1: memref<1x18x72xbf16, #tpu.memory_space<vmem>>, %arg2: memref<9x72x72xbf16, #tpu.memory_space<vmem>>, %arg3: memref<3x1x72xf32, #tpu.memory_space<vmem>>, %arg4: memref<1x16x64xf32, #tpu.memory_space<vmem>>) attributes {dimension_semantics = [#tpu.dimension_semantics<parallel>], iteration_bounds = array<i64: 2>, scalar_prefetch = 0 : i64, scratch_operands = 0 : i64, tpu.core_type = #tpu.core_type<tc>, window_params = [{transform_indices = @transform_0, window_bounds = array<i64: 1, 18, 72>}, {pipeline_mode = #tpu.pipeline_mode<synchronous>, transform_indices = @transform_1, window_bounds = array<i64: 9, 72, 72>}, {pipeline_mode = #tpu.pipeline_mode<synchronous>, transform_indices = @transform_2, window_bounds = array<i64: 3, 1, 72>}, {transform_indices = @transform_3, window_bounds = array<i64: 1, 16, 64>}]} {
    %c0 = arith.constant 0 : index
    %c0_0 = arith.constant 0 : index
    %c0_1 = arith.constant 0 : index
    %0 = vector.load %arg1[%c0, %c0_0, %c0_1] : memref<1x18x72xbf16, #tpu.memory_space<vmem>>, vector<1x18x72xbf16>
    %cst = arith.constant 0.000000e+00 : bf16
    %1 = vector.broadcast %cst : bf16 to vector<1x1x72xbf16>
    %2 = vector.extract_strided_slice %0 {offsets = [0, 0, 0], sizes = [1, 16, 72], strides = [1, 1, 1]} : vector<1x18x72xbf16> to vector<1x16x72xbf16>
    %3 = vector.shape_cast %2 : vector<1x16x72xbf16> to vector<16x72xbf16>
    %c0_2 = arith.constant 0 : index
    %c0_3 = arith.constant 0 : index
    %c0_4 = arith.constant 0 : index
    %4 = vector.load %arg2[%c0_2, %c0_3, %c0_4] : memref<9x72x72xbf16, #tpu.memory_space<vmem>>, vector<1x72x72xbf16>
    %5 = vector.shape_cast %4 : vector<1x72x72xbf16> to vector<72x72xbf16>
    %cst_5 = arith.constant dense<0.000000e+00> : vector<16x72xf32>
    %6 = tpu.matmul %3, %5, %cst_5 {dimension_numbers = #tpu.dot_dimension_numbers<[1], [0], [0], [1], [0, 0, 1, 1], [], []>} : vector<16x72xbf16>, vector<72x72xbf16>, vector<16x72xf32> -> vector<16x72xf32>
    %7 = vector.extract_strided_slice %0 {offsets = [0, 1, 0], sizes = [1, 16, 72], strides = [1, 1, 1]} : vector<1x18x72xbf16> to vector<1x16x72xbf16>
    %8 = vector.shape_cast %7 : vector<1x16x72xbf16> to vector<16x72xbf16>
    %c1 = arith.constant 1 : index
    %c0_6 = arith.constant 0 : index
    %c0_7 = arith.constant 0 : index
    %9 = vector.load %arg2[%c1, %c0_6, %c0_7] : memref<9x72x72xbf16, #tpu.memory_space<vmem>>, vector<1x72x72xbf16>
    %10 = vector.shape_cast %9 : vector<1x72x72xbf16> to vector<72x72xbf16>
    %cst_8 = arith.constant dense<0.000000e+00> : vector<16x72xf32>
    %11 = tpu.matmul %8, %10, %cst_8 {dimension_numbers = #tpu.dot_dimension_numbers<[1], [0], [0], [1], [0, 0, 1, 1], [], []>} : vector<16x72xbf16>, vector<72x72xbf16>, vector<16x72xf32> -> vector<16x72xf32>
    %12 = vector.extract_strided_slice %0 {offsets = [0, 2, 0], sizes = [1, 16, 72], strides = [1, 1, 1]} : vector<1x18x72xbf16> to vector<1x16x72xbf16>
    %13 = vector.shape_cast %12 : vector<1x16x72xbf16> to vector<16x72xbf16>
    %c2 = arith.constant 2 : index
    %c0_9 = arith.constant 0 : index
    %c0_10 = arith.constant 0 : index
    %14 = vector.load %arg2[%c2, %c0_9, %c0_10] : memref<9x72x72xbf16, #tpu.memory_space<vmem>>, vector<1x72x72xbf16>
    %15 = vector.shape_cast %14 : vector<1x72x72xbf16> to vector<72x72xbf16>
    %cst_11 = arith.constant dense<0.000000e+00> : vector<16x72xf32>
    %16 = tpu.matmul %13, %15, %cst_11 {dimension_numbers = #tpu.dot_dimension_numbers<[1], [0], [0], [1], [0, 0, 1, 1], [], []>} : vector<16x72xbf16>, vector<72x72xbf16>, vector<16x72xf32> -> vector<16x72xf32>
    %17 = arith.addf %6, %11 : vector<16x72xf32>
    %18 = arith.addf %17, %16 : vector<16x72xf32>
    %c0_12 = arith.constant 0 : index
    %c0_13 = arith.constant 0 : index
    %c0_14 = arith.constant 0 : index
    %19 = vector.load %arg3[%c0_12, %c0_13, %c0_14] : memref<3x1x72xf32, #tpu.memory_space<vmem>>, vector<1x1x72xf32>
    %20 = vector.shape_cast %19 : vector<1x1x72xf32> to vector<1x72xf32>
    %21 = vector.broadcast %20 : vector<1x72xf32> to vector<16x72xf32>
    %22 = arith.addf %18, %21 : vector<16x72xf32>
    %23 = arith.truncf %22 : vector<16x72xf32> to vector<16x72xbf16>
    %24 = vector.shape_cast %23 : vector<16x72xbf16> to vector<1x16x72xbf16>
    %25 = tpu.concatenate %1, %24, %1 in 1 : vector<1x1x72xbf16>, vector<1x16x72xbf16>, vector<1x1x72xbf16> -> vector<1x18x72xbf16>
    %26 = vector.extract_strided_slice %25 {offsets = [0, 0, 0], sizes = [1, 16, 72], strides = [1, 1, 1]} : vector<1x18x72xbf16> to vector<1x16x72xbf16>
    %27 = vector.shape_cast %26 : vector<1x16x72xbf16> to vector<16x72xbf16>
    %c3 = arith.constant 3 : index
    %c0_15 = arith.constant 0 : index
    %c0_16 = arith.constant 0 : index
    %28 = vector.load %arg2[%c3, %c0_15, %c0_16] : memref<9x72x72xbf16, #tpu.memory_space<vmem>>, vector<1x72x72xbf16>
    %29 = vector.shape_cast %28 : vector<1x72x72xbf16> to vector<72x72xbf16>
    %cst_17 = arith.constant dense<0.000000e+00> : vector<16x72xf32>
    %30 = tpu.matmul %27, %29, %cst_17 {dimension_numbers = #tpu.dot_dimension_numbers<[1], [0], [0], [1], [0, 0, 1, 1], [], []>} : vector<16x72xbf16>, vector<72x72xbf16>, vector<16x72xf32> -> vector<16x72xf32>
    %31 = vector.extract_strided_slice %25 {offsets = [0, 1, 0], sizes = [1, 16, 72], strides = [1, 1, 1]} : vector<1x18x72xbf16> to vector<1x16x72xbf16>
    %32 = vector.shape_cast %31 : vector<1x16x72xbf16> to vector<16x72xbf16>
    %c4 = arith.constant 4 : index
    %c0_18 = arith.constant 0 : index
    %c0_19 = arith.constant 0 : index
    %33 = vector.load %arg2[%c4, %c0_18, %c0_19] : memref<9x72x72xbf16, #tpu.memory_space<vmem>>, vector<1x72x72xbf16>
    %34 = vector.shape_cast %33 : vector<1x72x72xbf16> to vector<72x72xbf16>
    %cst_20 = arith.constant dense<0.000000e+00> : vector<16x72xf32>
    %35 = tpu.matmul %32, %34, %cst_20 {dimension_numbers = #tpu.dot_dimension_numbers<[1], [0], [0], [1], [0, 0, 1, 1], [], []>} : vector<16x72xbf16>, vector<72x72xbf16>, vector<16x72xf32> -> vector<16x72xf32>
    %36 = vector.extract_strided_slice %25 {offsets = [0, 2, 0], sizes = [1, 16, 72], strides = [1, 1, 1]} : vector<1x18x72xbf16> to vector<1x16x72xbf16>
    %37 = vector.shape_cast %36 : vector<1x16x72xbf16> to vector<16x72xbf16>
    %c5 = arith.constant 5 : index
    %c0_21 = arith.constant 0 : index
    %c0_22 = arith.constant 0 : index
    %38 = vector.load %arg2[%c5, %c0_21, %c0_22] : memref<9x72x72xbf16, #tpu.memory_space<vmem>>, vector<1x72x72xbf16>
    %39 = vector.shape_cast %38 : vector<1x72x72xbf16> to vector<72x72xbf16>
    %cst_23 = arith.constant dense<0.000000e+00> : vector<16x72xf32>
    %40 = tpu.matmul %37, %39, %cst_23 {dimension_numbers = #tpu.dot_dimension_numbers<[1], [0], [0], [1], [0, 0, 1, 1], [], []>} : vector<16x72xbf16>, vector<72x72xbf16>, vector<16x72xf32> -> vector<16x72xf32>
    %41 = arith.addf %30, %35 : vector<16x72xf32>
    %42 = arith.addf %41, %40 : vector<16x72xf32>
    %c1_24 = arith.constant 1 : index
    %c0_25 = arith.constant 0 : index
    %c0_26 = arith.constant 0 : index
    %43 = vector.load %arg3[%c1_24, %c0_25, %c0_26] : memref<3x1x72xf32, #tpu.memory_space<vmem>>, vector<1x1x72xf32>
    %44 = vector.shape_cast %43 : vector<1x1x72xf32> to vector<1x72xf32>
    %45 = vector.broadcast %44 : vector<1x72xf32> to vector<16x72xf32>
    %46 = arith.addf %42, %45 : vector<16x72xf32>
    %47 = arith.truncf %46 : vector<16x72xf32> to vector<16x72xbf16>
    %48 = vector.shape_cast %47 : vector<16x72xbf16> to vector<1x16x72xbf16>
    %49 = tpu.concatenate %1, %48, %1 in 1 : vector<1x1x72xbf16>, vector<1x16x72xbf16>, vector<1x1x72xbf16> -> vector<1x18x72xbf16>
    %50 = vector.extract_strided_slice %49 {offsets = [0, 0, 0], sizes = [1, 16, 72], strides = [1, 1, 1]} : vector<1x18x72xbf16> to vector<1x16x72xbf16>
    %51 = vector.shape_cast %50 : vector<1x16x72xbf16> to vector<16x72xbf16>
    %c6 = arith.constant 6 : index
    %c0_27 = arith.constant 0 : index
    %c0_28 = arith.constant 0 : index
    %52 = vector.load %arg2[%c6, %c0_27, %c0_28] : memref<9x72x72xbf16, #tpu.memory_space<vmem>>, vector<1x72x72xbf16>
    %53 = vector.shape_cast %52 : vector<1x72x72xbf16> to vector<72x72xbf16>
    %cst_29 = arith.constant dense<0.000000e+00> : vector<16x72xf32>
    %54 = tpu.matmul %51, %53, %cst_29 {dimension_numbers = #tpu.dot_dimension_numbers<[1], [0], [0], [1], [0, 0, 1, 1], [], []>} : vector<16x72xbf16>, vector<72x72xbf16>, vector<16x72xf32> -> vector<16x72xf32>
    %55 = vector.extract_strided_slice %49 {offsets = [0, 1, 0], sizes = [1, 16, 72], strides = [1, 1, 1]} : vector<1x18x72xbf16> to vector<1x16x72xbf16>
    %56 = vector.shape_cast %55 : vector<1x16x72xbf16> to vector<16x72xbf16>
    %c7 = arith.constant 7 : index
    %c0_30 = arith.constant 0 : index
    %c0_31 = arith.constant 0 : index
    %57 = vector.load %arg2[%c7, %c0_30, %c0_31] : memref<9x72x72xbf16, #tpu.memory_space<vmem>>, vector<1x72x72xbf16>
    %58 = vector.shape_cast %57 : vector<1x72x72xbf16> to vector<72x72xbf16>
    %cst_32 = arith.constant dense<0.000000e+00> : vector<16x72xf32>
    %59 = tpu.matmul %56, %58, %cst_32 {dimension_numbers = #tpu.dot_dimension_numbers<[1], [0], [0], [1], [0, 0, 1, 1], [], []>} : vector<16x72xbf16>, vector<72x72xbf16>, vector<16x72xf32> -> vector<16x72xf32>
    %60 = vector.extract_strided_slice %49 {offsets = [0, 2, 0], sizes = [1, 16, 72], strides = [1, 1, 1]} : vector<1x18x72xbf16> to vector<1x16x72xbf16>
    %61 = vector.shape_cast %60 : vector<1x16x72xbf16> to vector<16x72xbf16>
    %c8 = arith.constant 8 : index
    %c0_33 = arith.constant 0 : index
    %c0_34 = arith.constant 0 : index
    %62 = vector.load %arg2[%c8, %c0_33, %c0_34] : memref<9x72x72xbf16, #tpu.memory_space<vmem>>, vector<1x72x72xbf16>
    %63 = vector.shape_cast %62 : vector<1x72x72xbf16> to vector<72x72xbf16>
    %cst_35 = arith.constant dense<0.000000e+00> : vector<16x72xf32>
    %64 = tpu.matmul %61, %63, %cst_35 {dimension_numbers = #tpu.dot_dimension_numbers<[1], [0], [0], [1], [0, 0, 1, 1], [], []>} : vector<16x72xbf16>, vector<72x72xbf16>, vector<16x72xf32> -> vector<16x72xf32>
    %65 = arith.addf %54, %59 : vector<16x72xf32>
    %66 = arith.addf %65, %64 : vector<16x72xf32>
    %c2_36 = arith.constant 2 : index
    %c0_37 = arith.constant 0 : index
    %c0_38 = arith.constant 0 : index
    %67 = vector.load %arg3[%c2_36, %c0_37, %c0_38] : memref<3x1x72xf32, #tpu.memory_space<vmem>>, vector<1x1x72xf32>
    %68 = vector.shape_cast %67 : vector<1x1x72xf32> to vector<1x72xf32>
    %69 = vector.broadcast %68 : vector<1x72xf32> to vector<16x72xf32>
    %70 = arith.addf %66, %69 : vector<16x72xf32>
    %71 = arith.truncf %70 : vector<16x72xf32> to vector<16x72xbf16>
    %72 = vector.shape_cast %71 : vector<16x72xbf16> to vector<1x16x72xbf16>
    %73 = tpu.concatenate %1, %72, %1 in 1 : vector<1x1x72xbf16>, vector<1x16x72xbf16>, vector<1x1x72xbf16> -> vector<1x18x72xbf16>
    %74 = vector.extract_strided_slice %73 {offsets = [0, 1, 4], sizes = [1, 16, 64], strides = [1, 1, 1]} : vector<1x18x72xbf16> to vector<1x16x64xbf16>
    %75 = arith.extf %74 : vector<1x16x64xbf16> to vector<1x16x64xf32>
    %c0_39 = arith.constant 0 : index
    %c0_40 = arith.constant 0 : index
    %c0_41 = arith.constant 0 : index
    %76 = vector.load %arg4[%c0_39, %c0_40, %c0_41] : memref<1x16x64xf32, #tpu.memory_space<vmem>>, vector<1x16x64xf32>
    tpu.vector_store %arg4[%c0_39, %c0_40, %c0_41], %75 {strides = array<i32>} : memref<1x16x64xf32, #tpu.memory_space<vmem>>, vector<1x16x64xf32>,
    return
  }
  func.func @transform_0(%arg0: i32) -> (i32, i32, i32) {
    %c0_i32 = arith.constant 0 : i32
    %c0_i32_0 = arith.constant 0 : i32
    %c0_i32_1 = arith.constant 0 : i32
    return %arg0, %c0_i32, %c0_i32_0 : i32, i32, i32
  }
  func.func @transform_1(%arg0: i32) -> (i32, i32, i32) {
    %c0_i32 = arith.constant 0 : i32
    %c0_i32_0 = arith.constant 0 : i32
    %c0_i32_1 = arith.constant 0 : i32
    %c0_i32_2 = arith.constant 0 : i32
    return %c0_i32, %c0_i32_0, %c0_i32_1 : i32, i32, i32
  }
  func.func @transform_2(%arg0: i32) -> (i32, i32, i32) {
    %c0_i32 = arith.constant 0 : i32
    %c0_i32_0 = arith.constant 0 : i32
    %c0_i32_1 = arith.constant 0 : i32
    %c0_i32_2 = arith.constant 0 : i32
    return %c0_i32, %c0_i32_0, %c0_i32_1 : i32, i32, i32
  }
  func.func @transform_3(%arg0: i32) -> (i32, i32, i32) {
    %c0_i32 = arith.constant 0 : i32
    %c0_i32_0 = arith.constant 0 : i32
    %c0_i32_1 = arith.constant 0 : i32
    return %arg0, %c0_i32, %c0_i32_0 : i32, i32, i32
  }
}

</mosaic_0001>

<bundles_post_ra>
// kernel: model_forward.1
= control target key start
LH: loop header
LB: loop body
LE: loop exit
PB: predicated region body
PF: predicated region fallthrough
CT: control target
= control target key end

     0   :  { %s1557_s12 = smov 0   ;;  %s1825_s0 = inlined_call_operand.vmem [shape: bf16[2,18,72], index: 0, kind: input, shape index: {}]   ;;  %s1826_s1 = inlined_call_operand.vmem [shape: bf16[9,72,72], index: 1, kind: input, shape index: {}]   ;;  %s1827_s2 = inlined_call_operand.vmem [shape: f32[3,1,72], index: 2, kind: input, shape index: {}]   ;;  %s1828_s3 = inlined_call_operand.vmem [shape: f32[2,16,64], index: 3, kind: output, shape index: {}]  }
   0x1 LB: > { %s1138_s13 = sadd.s32 4294967295, %s1532_s12   ;;  %p1142_p0 = scmp.ge.s32.totalorder %s1532_s12, 1  ;;  %s1532_s12 = sphi %s1557_s12, %s13_s12  }
   0x2   : > { %p137_p1 = scmp.lt.s32.totalorder %s1532_s12, 3 }
   0x4   : > { %p138_p2 = pnand %p1142_p0, %p137_p1 }
   0x5   : > { %v1479_v0 = vld [vmem:[%s1826_s1 + $0x24] sm:$0xff] (!%p138_p2)   ;;  %v1534_v1 = vmov (!%p138_p2), 0.0   ;;  %v1480_v2 = vld [vmem:[%s1826_s1 + $0x2c] sm:$0xff] (!%p138_p2)   ;;  %vm1535_vm0 = vmmov (!%p138_p2), 0   ;;  %p161_p3 = scmp.lt.s32.totalorder (!%p138_p2), %s1138_s13, 1  ;;  %v1481_v3 = vld [vmem:[%s1826_s1 + $0x34] sm:$0xff] (!%p138_p2)  }
   0x6   : > { %141 = sbr.rel (%p138_p2) target bundleno = 911 (0x38f), region = 32  ;;  %1336 = vmatprep.subr.bf16.mxu0 (!%p138_p2), %v1534_v1  ;;  %1350 = vmatprep.subr.bf16.mxu1 (!%p138_p2), %v1534_v1  ;;  %v1486_v4 = vld [vmem:[%s1826_s1 + $0x48] sm:$0xff] (!%p138_p2)   ;;  %v1482_v5 = vld [vmem:[%s1826_s1 + $0x3c] sm:$0xff] (!%p138_p2)   ;;  %v1488_v6 = vld [vmem:[%s1826_s1 + $0x50] sm:$0xff] (!%p138_p2)   ;;  %vm202_vm1 = vsmask.f32 (!%p138_p2), 7424 }
   0x7   : > { %1337 = vmatpush3.bf16.msra.mxu0 (!%p138_p2), %v1479_v0  ;;  %1346 = vmatprep.mubr.msk.bf16.mxu0 (!%p138_p2), %vm1535_vm0, %v1534_v1  ;;  %v1483_v7 = vld [vmem:[%s1826_s1 + $0x44] ss:$0 sps:$4 sm:$0xff] (!%p138_p2)   ;;  %vm246_vm2 = vcmask (!%p138_p2), 1043456   ;;  %v1490_v10 = vld [vmem:[%s1826_s1 + $0x58] sm:$0xff] (!%p138_p2)   ;;  %vm242_vm3 = vcmask (!%p138_p2), 588800   ;;  %vm301_vm4 = vcmask (!%p138_p2), 1046528  }
   0x8   : > { %1338 = vmatprep.subr.bf16.mxu0 (!%p138_p2), %v1534_v1  ;;  %1360 = vmatprep.mubr.msk.bf16.mxu1 (!%p138_p2), %vm1535_vm0, %v1534_v1  ;;  %v248_v14 = vsel (!%p138_p2), %vm246_vm2, %v1483_v7, 0  ;;  %v1487_v17 = vld [vmem:[%s1826_s1] sm:$0xff] (!%p138_p2)   ;;  %v1494_v19 = vld [vmem:[%s1826_s1 + $0x68] ss:$0 sps:$4 sm:$0xff] (!%p138_p2)   ;;  %v1491_v26 = vld [vmem:[%s1826_s1 + $0x10] sm:$0xff] (!%p138_p2)   ;;  %vm473_vm5 = vcmask (!%p138_p2), 1040384  }
   0x9   : > { %1351 = vmatpush3.bf16.msra.mxu1 (!%p138_p2), %v1486_v4  ;;  %v1492_v18 = vld [vmem:[%s1826_s1 + $0x60] sm:$0xff] (!%p138_p2)   ;;  %v336_v22 = vsel (!%p138_p2), %vm246_vm2, %v1494_v19, 0  ;;  %v1489_v25 = vld [vmem:[%s1826_s1 + $0x8] sm:$0xff] (!%p138_p2)   ;;  %v1493_v28 = vld [vmem:[%s1826_s1 + $0x18] sm:$0xff] (!%p138_p2)   ;;  %vm474_vm6 = vsmask.f32 (!%p138_p2), 256 }
   0xa   : > { %1352 = vmatprep.subr.bf16.mxu1 (!%p138_p2), %v1534_v1  ;;  %v1495_v29 = vld [vmem:[%s1826_s1 + $0x20] ss:$0 sps:$4 sm:$0xff] (!%p138_p2)   ;;  %v1496_v31 = vld [vmem:[%s1826_s1 + $0xb4] sm:$0xff] (!%p138_p2)   ;;  %v1500_v35 = vld [vmem:[%s1826_s1 + $0xc4] sm:$0xff] (!%p138_p2)   ;;  %s1536_s14 = smov (!%p138_p2), 124   ;;  %vm1077_vm8 = vcmask (!%p138_p2), 523265  }
   0xb   : > { %1339 = vmatpush3.bf16.msra.mxu0 (!%p138_p2), %v1480_v2  ;;  %v409_v30 = vsel (!%p138_p2), %vm246_vm2, %v1495_v29, 0  ;;  %v1497_v32 = vld [vmem:[%s1826_s1 + $0x90] sm:$0xff] (!%p138_p2)   ;;  %v1498_v33 = vld [vmem:[%s1826_s1 + $0xbc] sm:$0xff] (!%p138_p2)   ;;  %v1503_v38 = vld [vmem:[%s1826_s1 + $0xa8] sm:$0xff] (!%p138_p2)   ;;  %vm1079_vm9 = vcmask (!%p138_p2), 523264   ;;  %vm1081_vm10 = vcmask (!%p138_p2), 516096  }
   0xc   : > { %1340 = vmatprep.subr.bf16.mxu0 (!%p138_p2), %v1534_v1  ;;  %v1499_v34 = vld [vmem:[%s1826_s1 + $0x98] sm:$0xff] (!%p138_p2)   ;;  %v1501_v36 = vld [vmem:[%s1826_s1 + $0xa0] sm:$0xff] (!%p138_p2)   ;;  %v1502_v37 = vld [vmem:[%s1826_s1 + $0xcc] sm:$0xff] (!%p138_p2)  }
   0xd   : > { %s1832_s13 = smov (!%p161_p3, %s1138_s13), 1  ;;  %1353 = vmatpush3.bf16.msra.mxu1 %v1488_v6  ;;  %v1504_v39 = vld [vmem:[%s1826_s1 + $0xd4] ss:$0 sps:$4 sm:$0xff]   ;;  %v1505_v41 = vld [vmem:[%s1826_s1 + $0xb0] ss:$0 sps:$4 sm:$0xff]   ;;  %vm1696_vm7 = vmand %vm473_vm5, %vm474_vm6 }
   0xe   : > { %s1462_s22 = smul.u32 12, %s1832_s13  ;;  %1354 = vmatprep.subr.bf16.mxu1 %v1534_v1  ;;  %v630_v40 = vsel %vm246_vm2, %v1504_v39, 0  ;;  %v541_v42 = vsel %vm246_vm2, %v1505_v41, 0  ;;  %v1184_v58 = vld [vmem:[%s1827_s2] ss:$0 sm:$0xff]  ;;  %v1517_v29 = vld [vmem:[%s1826_s1 + $0x138] sm:$0xff]  }
   0xf   : > { %1341 = vmatpush3.bf16.msra.mxu0 %v1481_v3  ;;  %v1508_v19 = vld [vmem:[%s1826_s1 + $0x7c] sm:$0xff]   ;;  %s1281_s15 = sshll.u32 %s1832_s13, 4 }
  0x10   : > { %s165_s4 = scalar_lea.vmem %s1825_s0, %s1462_s22  ;;  %1342 = vmatprep.subr.bf16.mxu0 %v1534_v1  ;;  %s170_s18 = scalar_lea.vmem %s1828_s3, %s1281_s15 }
  0x11   : > { %v1484_v8 = vld [vmem:[%s165_s4] sm:$0xff]   ;;  %v1485_v9 = vld [vmem:[%s165_s4 + $0x8] ss:$0 sps:$4 sm:$0x11]   ;;  %1355 = vmatpush3.bf16.msra.mxu1 %v1490_v10 }
  0x12   : > { %v204_v11 = vshrl.u32 %v1484_v8, 16  ;;  %v206_v12 = vshll.u32 %v1484_v8, 16  ;;  %v211_v13 = vshll.u32 %v1485_v9, 16  ;;  %1356 = vmatprep.subr.bf16.mxu1 %v1534_v1  ;;  %v302_v21 = vrot.slane %v1484_v8, 1 }
  0x13   : > { %1343 = vmatpush3.bf16.msra.mxu0 %v1482_v5  ;;  %v303_v23 = vrot.slane %v1485_v9, 1 }
  0x14   : > { %1344 = vmatprep.subr.bf16.mxu0 %v1534_v1  ;;  %v208_v15 = vrot.slane %v206_v12, 1  ;;  %v213_v16 = vrot.slane %v211_v13, 1 }
  0x15   : > { %1357 = vmatpush3.bf16.msra.mxu1 %v1492_v18  ;;  %v304_v27 = vsel %vm301_vm4, %v302_v21, %v303_v23  ;;  %v1507_v18 = vld [vmem:[%s1826_s1 + $0x74] sm:$0xff]   ;;  %v1510_v21 = vld [vmem:[%s1826_s1 + $0x8c] ss:$0 sps:$4 sm:$0xff]   ;;  %v1511_v23 = vld [vmem:[%s1826_s1 + $0x120] sm:$0xff]  }
  0x16   : > { %v209_v20 = vor.u32 %v208_v15, %v204_v11  ;;  %1358 = vmatprep.subr.bf16.mxu1 %v1534_v1 }
  0x17   : > { %1345 = vmatpush3.bf16.msra.mxu0 %v248_v14 }
  0x18   : > { %v214_v24 = vsel %vm202_vm1, %v209_v20, %v213_v16  ;;  %1364 = vmatprep.subr.bf16.mxu0 %v1534_v1  ;;  %v1506_v16 = vld [vmem:[%s1826_s1 + $0x6c] sm:$0xff]   ;;  %v1509_v20 = vld [vmem:[%s1826_s1 + $0x84] sm:$0xff]  }
  0x19   : > { %1359 = vmatpush3.bf16.msra.mxu1 %v336_v22  ;;  %v703_v22 = vsel %vm246_vm2, %v1510_v21, 0 }
  0x1a   : > { %1347 = vmatmul.mubr.msk.bf16.vlgmr.msra.gmra.mrb[0].mxu0 %vm242_vm3, %v214_v24  ;;  %1378 = vmatprep.subr.bf16.mxu1 %v1534_v1  ;;  %v1512_v24 = vld [vmem:[%s1826_s1 + $0xfc] sm:$0xff]  }
  0x1b   : > { %1365 = vmatpush3.bf16.msra.mxu0 %v1487_v17  ;;  %1374 = vmatprep.mubr.msk.bf16.mxu0 %vm1535_vm0, %v1534_v1 }
  0x1c   : > { %1366 = vmatprep.subr.bf16.mxu0 %v1534_v1  ;;  %1361 = vmatmul.mubr.msk.bf16.vlgmr.msra.gmra.mrb[0].mxu1 %vm242_vm3, %v304_v27  ;;  %v1515_v27 = vld [vmem:[%s1826_s1 + $0x130] sm:$0xff]  }
  0x1d   : > { %1388 = vmatprep.mubr.msk.bf16.mxu1 %vm1535_vm0, %v1534_v1  ;;  %1379 = vmatpush3.bf16.msra.mxu1 %v1497_v32 }
  0x1e   : > { %1380 = vmatprep.subr.bf16.mxu1 %v1534_v1 }
  0x1f   : > { %1367 = vmatpush3.bf16.msra.mxu0 %v1489_v25  ;;  %v1513_v25 = vld [vmem:[%s1826_s1 + $0x128] sm:$0xff]  }
  0x20   : > { %1368 = vmatprep.subr.bf16.mxu0 %v1534_v1 }
  0x21   : > { %1381 = vmatpush3.bf16.msra.mxu1 %v1499_v34 }
  0x22   : > { %1382 = vmatprep.subr.bf16.mxu1 %v1534_v1 }
  0x23   : > { %1369 = vmatpush3.bf16.msra.mxu0 %v1491_v26  ;;  %v1514_v26 = vld [vmem:[%s1826_s1 + $0x104] sm:$0xff]  }
  0x24   : > { %1370 = vmatprep.subr.bf16.mxu0 %v1534_v1 }
  0x25   : > { %1383 = vmatpush3.bf16.msra.mxu1 %v1501_v36 }
  0x26   : > { %1384 = vmatprep.subr.bf16.mxu1 %v1534_v1 }
  0x27   : > { %1371 = vmatpush3.bf16.msra.mxu0 %v1493_v28  ;;  %v1516_v28 = vld [vmem:[%s1826_s1 + $0x10c] sm:$0xff]  }
  0x28   : > { %1372 = vmatprep.subr.bf16.mxu0 %v1534_v1 }
  0x29   : > { %1385 = vmatpush3.bf16.msra.mxu1 %v1503_v38 }
  0x2a   : > { %1386 = vmatprep.subr.bf16.mxu1 %v1534_v1 }
  0x2b   : > { %1373 = vmatpush3.bf16.msra.mxu0 %v409_v30  ;;  %v1518_v30 = vld [vmem:[%s1826_s1 + $0x114] sm:$0xff]  }
  0x2c   : > { %1392 = vmatprep.subr.bf16.mxu0 %v1534_v1 }
  0x2d   : > { %1387 = vmatpush3.bf16.msra.mxu1 %v541_v42 }
  0x2e   : > { %1375 = vmatmul.mubr.msk.bf16.vlgmr.msra.gmra.mrb[4].mxu0 %vm242_vm3, %v1484_v8  ;;  %1406 = vmatprep.subr.bf16.mxu1 %v1534_v1 }
  0x2f   : > { %1402 = vmatprep.mubr.msk.bf16.mxu0 %vm1535_vm0, %v1534_v1  ;;  %1393 = vmatpush3.bf16.msra.mxu0 %v1496_v31  ;;  %v1519_v31 = vld [vmem:[%s1826_s1 + $0x140] ss:$0 sps:$4 sm:$0xff]  }
  0x30   : > { %1394 = vmatprep.subr.bf16.mxu0 %v1534_v1  ;;  %v922_v32 = vsel %vm246_vm2, %v1519_v31, 0 }
  0x33   : > { %1395 = vmatpush3.bf16.msra.mxu0 %v1498_v33  ;;  %v1520_v33 = vld [vmem:[%s1826_s1 + $0x11c] ss:$0 sps:$4 sm:$0xff]  }
  0x34   : > { %1396 = vmatprep.subr.bf16.mxu0 %v1534_v1  ;;  %v833_v34 = vsel %vm246_vm2, %v1520_v33, 0 }
  0x37   : > { %1397 = vmatpush3.bf16.msra.mxu0 %v1500_v35 }
  0x38   : > { %1398 = vmatprep.subr.bf16.mxu0 %v1534_v1 }
  0x3b   : > { %1399 = vmatpush3.bf16.msra.mxu0 %v1502_v37 }
  0x3c   : > { %1400 = vmatprep.subr.bf16.mxu0 %v1534_v1 }
  0x3f   : > { %1401 = vmatpush3.bf16.msra.mxu0 %v630_v40 }
  0x40   : > { %1420 = vmatprep.subr.bf16.mxu0 %v1534_v1 }
  0xed   : > { %v284_v43 = vpop.f32.mrb[0].mxu0 }
  0xee   : > { %v1348_v44 = vpop.f32.mrb[1].mxu0 }
  0xef   : > { %v287_v45 = vpop.f32.mrb[2].mxu0  ;;  %v372_v47 = vpop.f32.mrb[0].mxu1 }
  0xf0   : > { %v1349_v46 = vpop.f32.mrb[3].mxu0  ;;  %v1362_v48 = vpop.f32.mrb[1].mxu1 }
  0xf1   : > { %v375_v49 = vpop.f32.mrb[2].mxu1 }
  0xf2   : > { %v1363_v50 = vpop.f32.mrb[3].mxu1 }
  0xf3   : > { %v1231_v50 = vld [vmem:[%s1827_s2 + $0x1] ss:$0 sm:$0xff] }
 0x101   : > { %v445_v51 = vpop.f32.mrb[4].mxu0 }
 0x102   : > { %v446_v52 = vadd.f32 %v445_v51, %v284_v43  ;;  %v1376_v53 = vpop.f32.mrb[5].mxu0 }
 0x103   : > { %v448_v54 = vpop.f32.mrb[6].mxu0 }
 0x104   : > { %v452_v55 = vadd.f32 %v446_v52, %v372_v47  ;;  %v449_v56 = vadd.f32 %v448_v54, %v287_v45  ;;  %v1377_v57 = vpop.f32.mrb[7].mxu0 }
 0x106   : > { %v453_v59 = vadd.f32 %v449_v56, %v375_v49  ;;  %v461_v60 = vadd.f32 %v1184_v58, %v452_v55 }
 0x108   : > { %v462_v61 = vadd.f32 %v1184_v58, %v453_v59 }
 0x10a   : > { %v463_v62 = vpack.c.bf16 %v462_v61, %v461_v60 }
 0x10c   : > { %v465_v63 = vshrl.u32 %v463_v62, 16  ;;  %v468_v3 = vshll.u32 %v463_v62, 16 }
 0x10e   : > { %v467_v2 = vrot.slane %v465_v63, 7 }
 0x110   : > { %v470_v4 = vor.u32 %v468_v3, %v467_v2  ;;  %v477_v5 = vsel %vm1696_vm7, %v467_v2, 0 }
 0x111   : > { %v597_v8 = vrot.slane %v477_v5, 1  ;;  %v506_v10 = vshll.u32 %v477_v5, 16 }
 0x112   : > { %v476_v6 = vsel %vm1696_vm7, 0, %v470_v4 }
 0x113   : > { %v596_v7 = vrot.slane %v476_v6, 1  ;;  %v501_v9 = vshll.u32 %v476_v6, 16  ;;  %v499_v12 = vshrl.u32 %v476_v6, 16  ;;  %v508_v15 = vrot.slane %v506_v10, 1  ;;  %v1522_v10 = vld [vmem:[%s1826_s1 + $0xe0] sm:$0xff]  }
 0x115   : > { %v598_v11 = vsel %vm301_vm4, %v596_v7, %v597_v8  ;;  %v503_v13 = vrot.slane %v501_v9, 1  ;;  %v1521_v8 = vld [vmem:[%s1826_s1 + $0xd8] sm:$0xff]  }
 0x116   : > { %1403 = vmatmul.mubr.msk.bf16.vlgmr.msra.gmra.mrb[8].mxu0 %vm242_vm3, %v598_v11  ;;  %v1523_v11 = vld [vmem:[%s1826_s1 + $0xe8] sm:$0xff]  }
 0x117   : > { %v504_v14 = vor.u32 %v503_v13, %v499_v12  ;;  %1430 = vmatprep.mubr.msk.bf16.mxu0 %vm1535_vm0, %v1534_v1  ;;  %1421 = vmatpush3.bf16.msra.mxu0 %v1512_v24  ;;  %v1524_v12 = vld [vmem:[%s1826_s1 + $0xf0] sm:$0xff]   ;;  %v1525_v13 = vld [vmem:[%s1826_s1 + $0xf8] ss:$0 sps:$4 sm:$0xff]  }
 0x118   : > { %1422 = vmatprep.subr.bf16.mxu0 %v1534_v1 }
 0x119   : > { %v509_v17 = vsel %vm202_vm1, %v504_v14, %v508_v15  ;;  %v995_v14 = vsel %vm246_vm2, %v1525_v13, 0 }
 0x11a   : > { %1389 = vmatmul.mubr.msk.bf16.vlgmr.msra.gmra.mrb[4].mxu1 %vm242_vm3, %v509_v17 }
 0x11b   : > { %1407 = vmatpush3.bf16.msra.mxu1 %v1506_v16  ;;  %1416 = vmatprep.mubr.msk.bf16.mxu1 %vm1535_vm0, %v1534_v1 }
 0x11c   : > { %1408 = vmatprep.subr.bf16.mxu1 %v1534_v1  ;;  %1423 = vmatpush3.bf16.msra.mxu0 %v1514_v26 }
 0x11d   : > { %1424 = vmatprep.subr.bf16.mxu0 %v1534_v1 }
 0x11f   : > { %1409 = vmatpush3.bf16.msra.mxu1 %v1507_v18 }
 0x120   : > { %1410 = vmatprep.subr.bf16.mxu1 %v1534_v1  ;;  %1425 = vmatpush3.bf16.msra.mxu0 %v1516_v28 }
 0x121   : > { %1426 = vmatprep.subr.bf16.mxu0 %v1534_v1 }
 0x123   : > { %1411 = vmatpush3.bf16.msra.mxu1 %v1508_v19 }
 0x124   : > { %1412 = vmatprep.subr.bf16.mxu1 %v1534_v1  ;;  %1427 = vmatpush3.bf16.msra.mxu0 %v1518_v30 }
 0x125   : > { %1428 = vmatprep.subr.bf16.mxu0 %v1534_v1 }
 0x127   : > { %1413 = vmatpush3.bf16.msra.mxu1 %v1509_v20 }
 0x128   : > { %1414 = vmatprep.subr.bf16.mxu1 %v1534_v1  ;;  %1429 = vmatpush3.bf16.msra.mxu0 %v833_v34 }
 0x129   : > { %1448 = vmatprep.subr.bf16.mxu0 %v1534_v1 }
 0x12b   : > { %1415 = vmatpush3.bf16.msra.mxu1 %v703_v22 }
 0x12c   : > { %1434 = vmatprep.subr.bf16.mxu1 %v1534_v1 }
 0x12e   : > { %1417 = vmatmul.mubr.msk.bf16.vlgmr.msra.gmra.mrb[8].mxu1 %vm242_vm3, %v476_v6 }
 0x12f   : > { %1444 = vmatprep.mubr.msk.bf16.mxu1 %vm1535_vm0, %v1534_v1  ;;  %1435 = vmatpush3.bf16.msra.mxu1 %v1511_v23 }
 0x130   : > { %1436 = vmatprep.subr.bf16.mxu1 %v1534_v1 }
 0x133   : > { %1437 = vmatpush3.bf16.msra.mxu1 %v1513_v25 }
 0x134   : > { %1438 = vmatprep.subr.bf16.mxu1 %v1534_v1 }
 0x137   : > { %1439 = vmatpush3.bf16.msra.mxu1 %v1515_v27 }
 0x138   : > { %1440 = vmatprep.subr.bf16.mxu1 %v1534_v1 }
 0x13b   : > { %1441 = vmatpush3.bf16.msra.mxu1 %v1517_v29  ;;  %v1278_v29 = vld [vmem:[%s1827_s2 + $0x2] ss:$0 sm:$0xff] }
 0x13c   : > { %1442 = vmatprep.subr.bf16.mxu1 %v1534_v1 }
 0x13f   : > { %1443 = vmatpush3.bf16.msra.mxu1 %v922_v32 }
 0x1e9   : > { %v666_v35 = vpop.f32.mrb[8].mxu0 }
 0x1ea   : > { %v1404_v36 = vpop.f32.mrb[9].mxu0 }
 0x1eb   : > { %v669_v37 = vpop.f32.mrb[10].mxu0 }
 0x1ec   : > { %v1405_v38 = vpop.f32.mrb[11].mxu0 }
 0x1ed   : > { %v577_v39 = vpop.f32.mrb[4].mxu1 }
 0x1ee   : > { %v1390_v40 = vpop.f32.mrb[5].mxu1 }
 0x1ef   : > { %v580_v41 = vpop.f32.mrb[6].mxu1 }
 0x1f0   : > { %v1391_v42 = vpop.f32.mrb[7].mxu1 }
 0x201   : > { %v739_v43 = vpop.f32.mrb[8].mxu1 }
 0x202   : > { %v740_v44 = vadd.f32 %v739_v43, %v577_v39  ;;  %v1418_v45 = vpop.f32.mrb[9].mxu1 }
 0x203   : > { %v742_v46 = vpop.f32.mrb[10].mxu1 }
 0x204   : > { %v746_v47 = vadd.f32 %v740_v44, %v666_v35  ;;  %v743_v48 = vadd.f32 %v742_v46, %v580_v41  ;;  %v1419_v49 = vpop.f32.mrb[11].mxu1 }
 0x206   : > { %v747_v51 = vadd.f32 %v743_v48, %v669_v37  ;;  %v756_v52 = vadd.f32 %v1231_v50, %v746_v47 }
 0x208   : > { %v757_v53 = vadd.f32 %v1231_v50, %v747_v51 }
 0x20a   : > { %v758_v54 = vpack.c.bf16 %v757_v53, %v756_v52 }
 0x20c   : > { %v760_v55 = vshrl.u32 %v758_v54, 16  ;;  %v763_v57 = vshll.u32 %v758_v54, 16 }
 0x20e   : > { %v762_v56 = vrot.slane %v760_v55, 7 }
 0x210   : > { %v765_v58 = vor.u32 %v763_v57, %v762_v56  ;;  %v769_v59 = vsel %vm1696_vm7, %v762_v56, 0 }
 0x211   : > { %v889_v62 = vrot.slane %v769_v59, 1  ;;  %v798_v2 = vshll.u32 %v769_v59, 16 }
 0x212   : > { %v768_v60 = vsel %vm1696_vm7, 0, %v765_v58 }
 0x213   : > { %v888_v61 = vrot.slane %v768_v60, 1  ;;  %v793_v63 = vshll.u32 %v768_v60, 16  ;;  %v791_v4 = vshrl.u32 %v768_v60, 16  ;;  %v800_v7 = vrot.slane %v798_v2, 1 }
 0x215   : > { %v890_v3 = vsel %vm301_vm4, %v888_v61, %v889_v62  ;;  %v795_v5 = vrot.slane %v793_v63, 1 }
 0x216   : > { %1445 = vmatmul.mubr.msk.bf16.vlgmr.msra.gmra.mrb[12].mxu1 %vm242_vm3, %v890_v3 }
 0x217   : > { %v796_v6 = vor.u32 %v795_v5, %v791_v4 }
 0x219   : > { %v801_v9 = vsel %vm202_vm1, %v796_v6, %v800_v7 }
 0x21a   : > { %1431 = vmatmul.mubr.msk.bf16.vlgmr.msra.gmra.mrb[12].mxu0 %vm242_vm3, %v801_v9 }
 0x21b   : > { %1449 = vmatpush3.bf16.msra.mxu0 %v1521_v8  ;;  %1458 = vmatprep.mubr.msk.bf16.mxu0 %vm1535_vm0, %v1534_v1 }
 0x21c   : > { %1450 = vmatprep.subr.bf16.mxu0 %v1534_v1 }
 0x21f   : > { %1451 = vmatpush3.bf16.msra.mxu0 %v1522_v10 }
 0x220   : > { %1452 = vmatprep.subr.bf16.mxu0 %v1534_v1 }
 0x223   : > { %1453 = vmatpush3.bf16.msra.mxu0 %v1523_v11 }
 0x224   : > { %1454 = vmatprep.subr.bf16.mxu0 %v1534_v1 }
 0x227   : > { %1455 = vmatpush3.bf16.msra.mxu0 %v1524_v12 }
 0x228   : > { %1456 = vmatprep.subr.bf16.mxu0 %v1534_v1 }
 0x22b   : > { %1457 = vmatpush3.bf16.msra.mxu0 %v995_v14 }
 0x22e   : > { %1459 = vmatmul.mubr.msk.bf16.vlgmr.msra.gmra.mrb[16].mxu0 %vm242_vm3, %v768_v60 }
 0x2e9   : > { %v958_v15 = vpop.f32.mrb[12].mxu1 }
 0x2ea   : > { %v1446_v16 = vpop.f32.mrb[13].mxu1 }
 0x2eb   : > { %v961_v17 = vpop.f32.mrb[14].mxu1 }
 0x2ec   : > { %v1447_v18 = vpop.f32.mrb[15].mxu1 }
 0x2ed   : > { %v869_v19 = vpop.f32.mrb[12].mxu0 }
 0x2ee   : > { %v1432_v20 = vpop.f32.mrb[13].mxu0 }
 0x2ef   : > { %v872_v21 = vpop.f32.mrb[14].mxu0 }
 0x2f0   : > { %v1433_v22 = vpop.f32.mrb[15].mxu0 }
 0x301   : > { %v1031_v23 = vpop.f32.mrb[16].mxu0 }
 0x302   : > { %v1032_v24 = vadd.f32 %v1031_v23, %v869_v19  ;;  %v1460_v25 = vpop.f32.mrb[17].mxu0 }
 0x303   : > { %v1034_v26 = vpop.f32.mrb[18].mxu0 }
 0x304   : > { %v1038_v27 = vadd.f32 %v1032_v24, %v958_v15  ;;  %v1035_v28 = vadd.f32 %v1034_v26, %v872_v21  ;;  %v1461_v1 = vpop.f32.mrb[19].mxu0 }
 0x306   : > { %v1039_v30 = vadd.f32 %v1035_v28, %v961_v17  ;;  %v1048_v31 = vadd.f32 %v1278_v29, %v1038_v27 }
 0x308   : > { %v1049_v32 = vadd.f32 %v1278_v29, %v1039_v30 }
 0x30a   : > { %v1050_v33 = vpack.c.bf16 %v1049_v32, %v1048_v31 }
 0x30c   : > { %v1052_v34 = vshrl.u32 %v1050_v33, 16  ;;  %v1055_v36 = vshll.u32 %v1050_v33, 16 }
 0x30e   : > { %v1054_v35 = vrot.slane %v1052_v34, 7 }
 0x310   : > { %v1057_v37 = vor.u32 %v1055_v36, %v1054_v35  ;;  %v1061_v42 = vsel %vm1696_vm7, %v1054_v35, 0 }
 0x311   : > { %v1064_v43 = vunpack.c.l.bf16 %v1061_v42 }
 0x312   : > { %v1060_v38 = vsel %vm1696_vm7, 0, %v1057_v37 }
 0x313   : > { %v1062_v39 = vunpack.c.l.bf16 %v1060_v38  ;;  %v1063_v40 = vunpack.c.h.bf16 %v1060_v38 }
 0x315   : > { %v1474_v41 = vpack.i.bf16 %v1063_v40, %v1062_v39 }
 0x317   : > { %1475 = vrot.lane.b32.xlu0 %v1474_v41, %s1536_s14 }
 0x31b   : > { %1072 = vrot.lane.b32.xlu0 %v1064_v43, %s1536_s14 }
 0x389   : > { %v1476_v44 = vpop.permute.xlu0 %1475 }
 0x38a   : > { %v1478_v45 = vunpack.i.h.bf16 %v1476_v44  ;;  %v1477_v46 = vunpack.i.l.bf16 %v1476_v44 }
 0x38c   : > { %1078 = vst.msk [vmem:[%s170_s18 - $0x1] sm:$0xfe] %vm1077_vm8, %v1477_v46 }
 0x38d   : > { %1080 = vst.msk [vmem:[%s170_s18 + $0x7] sm:$0xff] %vm1079_vm9, %v1478_v45  ;;  %v1073_v47 = vpop.permute.xlu0 %1072 }
 0x38e   : > { %1082 = vst.msk [vmem:[%s170_s18 + $0xf] sm:$0x1] %vm1081_vm10, %v1073_v47 }
 0x38f PF: > { %s13_s12 = sadd.s32 1, %s1532_s12  }
 0x390   : > { %p10_p4 = scmp.ge.s32.totalorder %s13_s12, 4  }
 0x392   :  { %12 = sbr.rel (!%p10_p4) target bundleno = 1 (0x1), region = 72 }

</bundles_post_ra>
